<compile_context>
chip_gen: v7x
topology: tpu7x:2x2x1
jax: 0.10.0
libtpu: 0.0.40
codegen_flags: <defaults>
</compile_context>

<pallas_src>
import functools

import jax
import jax.numpy as jnp
from jax.experimental import pallas as pl
from jax.experimental.pallas import tpu as pltpu

LANE = 128
SUBLANE = 8
DEFAULT_TB = 512  # batch rows per grid step


def _round_up(n, m):
    return (n + m - 1) // m * m


def mlp_kernel(x_ref,
               w1_ref, b1_ref,
               w2_ref, b2_ref,
               w3_ref, b3_ref,
               w4_ref, b4_ref,
               o_ref):
    """Fused 4-layer MLP on one (TB, in_size) batch tile.

    Weights/biases are pre-transposed to (in, out) / (1, out) and resident in
    VMEM across all grid steps; only x and the output tile stream. All dots
    accumulate in f32 on the MXU regardless of the storage dtype.
    """
    cdt = w1_ref.dtype
    h = x_ref[...].astype(cdt)

    # Layer 1: Linear(input_size, 32) + ReLU
    h = jnp.dot(h, w1_ref[...], preferred_element_type=jnp.float32) + b1_ref[...]
    h = jnp.maximum(h, 0.0).astype(cdt)

    # Layer 2: Linear(32, 128) + ReLU
    h = jnp.dot(h, w2_ref[...], preferred_element_type=jnp.float32) + b2_ref[...]
    h = jnp.maximum(h, 0.0).astype(cdt)

    # Layer 3: Linear(128, 64) + ReLU
    h = jnp.dot(h, w3_ref[...], preferred_element_type=jnp.float32) + b3_ref[...]
    h = jnp.maximum(h, 0.0).astype(cdt)

    # Layer 4: Linear(64, output_padded_to_128)  (no activation)
    # Output tile is lane-dense (last dim is a multiple of 128) -> unmasked vst.
    o_ref[...] = (jnp.dot(h, w4_ref[...], preferred_element_type=jnp.float32)
                  + b4_ref[...]).astype(o_ref.dtype)


def prepare_params(params, dtype=jnp.float32):
    """One-time glue, done OUTSIDE the per-call path.

    PyTorch-style params (wN: (out, in), bN: (out,)) ->
      wN: (in, out), bN: (1, out), with the LAST layer's output dim padded to
      a multiple of 128 lanes (zero padding -> extra output columns are exact
      zeros and get sliced off in the wrapper).
    Returns a flat tuple (w1, b1, ..., w4, b4).
    """
    out_size = params["w4"].shape[0]
    out_pad = _round_up(out_size, LANE)
    prepped = []
    for i in range(1, 5):
        w = jnp.asarray(params[f"w{i}"], dtype).T            # (in, out)
        b = jnp.asarray(params[f"b{i}"], dtype).reshape(1, -1)
        if i == 4 and out_pad != out_size:
            w = jnp.pad(w, ((0, 0), (0, out_pad - out_size)))
            b = jnp.pad(b, ((0, 0), (0, out_pad - out_size)))
        prepped += [w, b]
    return tuple(prepped)


@functools.partial(jax.jit, static_argnames=("out_size", "block_b"))
def neural_network_forward(x, w1, b1, w2, b2, w3, b3, w4, b4, *,
                           out_size, block_b=DEFAULT_TB):
    """Jitted forward. x: (batch, input_size) f32. Returns (batch, out_size)."""
    batch, in_size = x.shape
    out_pad = w4.shape[1]  # 128-padded output width

    # Batch tile: multiple of 8 sublanes, capped at block_b. Pad batch so the
    # grid divides evenly (zero rows are computed and discarded).
    tb = min(block_b, _round_up(batch, SUBLANE))
    padded_batch = _round_up(batch, tb)
    if padded_batch != batch:
        x = jnp.pad(x, ((0, padded_batch - batch), (0, 0)))

    const = lambda i: (0, 0)  # weights/biases: same block every step (resident)

    out = pl.pallas_call(
        mlp_kernel,
        out_shape=jax.ShapeDtypeStruct((padded_batch, out_pad), jnp.float32),
        grid=(padded_batch // tb,),
        in_specs=[
            pl.BlockSpec((tb, in_size), lambda i: (i, 0)),   # x: streamed tile
            pl.BlockSpec(w1.shape, const), pl.BlockSpec(b1.shape, const),
            pl.BlockSpec(w2.shape, const), pl.BlockSpec(b2.shape, const),
            pl.BlockSpec(w3.shape, const), pl.BlockSpec(b3.shape, const),
            pl.BlockSpec(w4.shape, const), pl.BlockSpec(b4.shape, const),
        ],
        out_specs=pl.BlockSpec((tb, out_pad), lambda i: (i, 0)),
        compiler_params=pltpu.CompilerParams(
            dimension_semantics=("parallel",)),
    )(x, w1, b1, w2, b2, w3, b3, w4, b4)

    return out[:batch, :out_size]


def init_params(key, input_size, output_size):
    """Deterministic init mirroring nn.Linear default (uniform +/- 1/sqrt(fan_in))."""
    dims = [(32, input_size), (128, 32), (64, 128), (output_size, 64)]
    params = {}
    for i, (out_f, in_f) in enumerate(dims, start=1):
        key, kw, kb = jax.random.split(key, 3)
        bound = 1.0 / jnp.sqrt(jnp.float32(in_f))
        params[f"w{i}"] = jax.random.uniform(
            kw, (out_f, in_f), jnp.float32, minval=-bound, maxval=bound)
        params[f"b{i}"] = jax.random.uniform(
            kb, (out_f,), jnp.float32, minval=-bound, maxval=bound)
    return params


def _ref_forward(x, p):
    h = jnp.maximum(x @ p["w1"].T + p["b1"], 0.0)
    h = jnp.maximum(h @ p["w2"].T + p["b2"], 0.0)
    h = jnp.maximum(h @ p["w3"].T + p["b3"], 0.0)
    return h @ p["w4"].T + p["b4"]


if __name__ == "__main__":
    key = jax.random.PRNGKey(0)
    input_size = 16
    output_size = 8
    batch = 4

    key, kx = jax.random.split(key)
    x = jax.random.normal(kx, (batch, input_size), jnp.float32)
    params = init_params(key, input_size, output_size)

    # One-time glue (transpose / reshape / lane-pad) -- NOT on the per-call path.
    flat = prepare_params(params, dtype=jnp.float32)

    # Small-batch call (single partial tile).
    out = neural_network_forward(x, *flat, out_size=output_size)
    jax.block_until_ready(out)
    expected = _ref_forward(x, params)
    assert out.shape == (batch, output_size)
    assert jnp.allclose(out, expected, atol=1e-5, rtol=1e-5)

    # Larger batch exercising the multi-step grid + batch padding path.
    key, kx2 = jax.random.split(key)
    x_big = jax.random.normal(kx2, (1030, input_size), jnp.float32)
    out_big = neural_network_forward(x_big, *flat, out_size=output_size)
    jax.block_until_ready(out_big)
    assert out_big.shape == (1030, output_size)
    assert jnp.allclose(out_big, _ref_forward(x_big, params), atol=1e-5, rtol=1e-5)

    print("KERNEL_OK")
</pallas_src>

<mosaic_0001>
module attributes {stable_mosaic.version = 11 : i64} {
  func.func @mlp_kernel(%arg0: i32, %arg1: memref<8x16xf32, #tpu.memory_space<vmem>>, %arg2: memref<16x32xf32, #tpu.memory_space<vmem>>, %arg3: memref<1x32xf32, #tpu.memory_space<vmem>>, %arg4: memref<32x128xf32, #tpu.memory_space<vmem>>, %arg5: memref<1x128xf32, #tpu.memory_space<vmem>>, %arg6: memref<128x64xf32, #tpu.memory_space<vmem>>, %arg7: memref<1x64xf32, #tpu.memory_space<vmem>>, %arg8: memref<64x128xf32, #tpu.memory_space<vmem>>, %arg9: memref<1x128xf32, #tpu.memory_space<vmem>>, %arg10: memref<8x128xf32, #tpu.memory_space<vmem>>) attributes {dimension_semantics = [#tpu.dimension_semantics<parallel>], iteration_bounds = array<i64: 1>, scalar_prefetch = 0 : i64, scratch_operands = 0 : i64, tpu.core_type = #tpu.core_type<tc>, window_params = [{transform_indices = @transform_0, window_bounds = array<i64: 8, 16>}, {pipeline_mode = #tpu.pipeline_mode<synchronous>, transform_indices = @transform_1, window_bounds = array<i64: 16, 32>}, {pipeline_mode = #tpu.pipeline_mode<synchronous>, transform_indices = @transform_2, window_bounds = array<i64: 1, 32>}, {pipeline_mode = #tpu.pipeline_mode<synchronous>, transform_indices = @transform_3, window_bounds = array<i64: 32, 128>}, {pipeline_mode = #tpu.pipeline_mode<synchronous>, transform_indices = @transform_4, window_bounds = array<i64: 1, 128>}, {pipeline_mode = #tpu.pipeline_mode<synchronous>, transform_indices = @transform_5, window_bounds = array<i64: 128, 64>}, {pipeline_mode = #tpu.pipeline_mode<synchronous>, transform_indices = @transform_6, window_bounds = array<i64: 1, 64>}, {pipeline_mode = #tpu.pipeline_mode<synchronous>, transform_indices = @transform_7, window_bounds = array<i64: 64, 128>}, {pipeline_mode = #tpu.pipeline_mode<synchronous>, transform_indices = @transform_8, window_bounds = array<i64: 1, 128>}, {transform_indices = @transform_9, window_bounds = array<i64: 8, 128>}]} {
    %c0 = arith.constant 0 : index
    %c0_0 = arith.constant 0 : index
    %0 = vector.load %arg1[%c0, %c0_0] : memref<8x16xf32, #tpu.memory_space<vmem>>, vector<8x16xf32>
    %c0_1 = arith.constant 0 : index
    %c0_2 = arith.constant 0 : index
    %1 = vector.load %arg2[%c0_1, %c0_2] : memref<16x32xf32, #tpu.memory_space<vmem>>, vector<16x32xf32>
    %cst = arith.constant dense<0.000000e+00> : vector<8x32xf32>
    %2 = tpu.matmul %0, %1, %cst {dimension_numbers = #tpu.dot_dimension_numbers<[1], [0], [0], [1], [0, 0, 1, 1], [], []>} : vector<8x16xf32>, vector<16x32xf32>, vector<8x32xf32> -> vector<8x32xf32>
    %c0_3 = arith.constant 0 : index
    %c0_4 = arith.constant 0 : index
    %3 = vector.load %arg3[%c0_3, %c0_4] : memref<1x32xf32, #tpu.memory_space<vmem>>, vector<1x32xf32>
    %4 = vector.broadcast %3 : vector<1x32xf32> to vector<8x32xf32>
    %5 = arith.addf %2, %4 : vector<8x32xf32>
    %cst_5 = arith.constant 0.000000e+00 : f32
    %6 = vector.broadcast %cst_5 : f32 to vector<8x32xf32>
    %7 = arith.maximumf %5, %6 : vector<8x32xf32>
    %c0_6 = arith.constant 0 : index
    %c0_7 = arith.constant 0 : index
    %8 = vector.load %arg4[%c0_6, %c0_7] : memref<32x128xf32, #tpu.memory_space<vmem>>, vector<32x128xf32>
    %cst_8 = arith.constant dense<0.000000e+00> : vector<8x128xf32>
    %9 = tpu.matmul %7, %8, %cst_8 {dimension_numbers = #tpu.dot_dimension_numbers<[1], [0], [0], [1], [0, 0, 1, 1], [], []>} : vector<8x32xf32>, vector<32x128xf32>, vector<8x128xf32> -> vector<8x128xf32>
    %c0_9 = arith.constant 0 : index
    %c0_10 = arith.constant 0 : index
    %10 = vector.load %arg5[%c0_9, %c0_10] : memref<1x128xf32, #tpu.memory_space<vmem>>, vector<1x128xf32>
    %11 = vector.broadcast %10 : vector<1x128xf32> to vector<8x128xf32>
    %12 = arith.addf %9, %11 : vector<8x128xf32>
    %cst_11 = arith.constant 0.000000e+00 : f32
    %13 = vector.broadcast %cst_11 : f32 to vector<8x128xf32>
    %14 = arith.maximumf %12, %13 : vector<8x128xf32>
    %c0_12 = arith.constant 0 : index
    %c0_13 = arith.constant 0 : index
    %15 = vector.load %arg6[%c0_12, %c0_13] : memref<128x64xf32, #tpu.memory_space<vmem>>, vector<128x64xf32>
    %cst_14 = arith.constant dense<0.000000e+00> : vector<8x64xf32>
    %16 = tpu.matmul %14, %15, %cst_14 {dimension_numbers = #tpu.dot_dimension_numbers<[1], [0], [0], [1], [0, 0, 1, 1], [], []>} : vector<8x128xf32>, vector<128x64xf32>, vector<8x64xf32> -> vector<8x64xf32>
    %c0_15 = arith.constant 0 : index
    %c0_16 = arith.constant 0 : index
    %17 = vector.load %arg7[%c0_15, %c0_16] : memref<1x64xf32, #tpu.memory_space<vmem>>, vector<1x64xf32>
    %18 = vector.broadcast %17 : vector<1x64xf32> to vector<8x64xf32>
    %19 = arith.addf %16, %18 : vector<8x64xf32>
    %cst_17 = arith.constant 0.000000e+00 : f32
    %20 = vector.broadcast %cst_17 : f32 to vector<8x64xf32>
    %21 = arith.maximumf %19, %20 : vector<8x64xf32>
    %c0_18 = arith.constant 0 : index
    %c0_19 = arith.constant 0 : index
    %22 = vector.load %arg8[%c0_18, %c0_19] : memref<64x128xf32, #tpu.memory_space<vmem>>, vector<64x128xf32>
    %cst_20 = arith.constant dense<0.000000e+00> : vector<8x128xf32>
    %23 = tpu.matmul %21, %22, %cst_20 {dimension_numbers = #tpu.dot_dimension_numbers<[1], [0], [0], [1], [0, 0, 1, 1], [], []>} : vector<8x64xf32>, vector<64x128xf32>, vector<8x128xf32> -> vector<8x128xf32>
    %c0_21 = arith.constant 0 : index
    %c0_22 = arith.constant 0 : index
    %24 = vector.load %arg9[%c0_21, %c0_22] : memref<1x128xf32, #tpu.memory_space<vmem>>, vector<1x128xf32>
    %25 = vector.broadcast %24 : vector<1x128xf32> to vector<8x128xf32>
    %26 = arith.addf %23, %25 : vector<8x128xf32>
    %c0_23 = arith.constant 0 : index
    %c0_24 = arith.constant 0 : index
    %27 = vector.load %arg10[%c0_23, %c0_24] : memref<8x128xf32, #tpu.memory_space<vmem>>, vector<8x128xf32>
    tpu.vector_store %arg10[%c0_23, %c0_24], %26 {strides = array<i32>} : memref<8x128xf32, #tpu.memory_space<vmem>>, vector<8x128xf32>,
    return
  }
  func.func @transform_0(%arg0: i32) -> (i32, i32) {
    %c0_i32 = arith.constant 0 : i32
    %c0_i32_0 = arith.constant 0 : i32
    return %arg0, %c0_i32 : i32, i32
  }
  func.func @transform_1(%arg0: i32) -> (i32, i32) {
    %c0_i32 = arith.constant 0 : i32
    %c0_i32_0 = arith.constant 0 : i32
    %c0_i32_1 = arith.constant 0 : i32
    return %c0_i32, %c0_i32_0 : i32, i32
  }
  func.func @transform_2(%arg0: i32) -> (i32, i32) {
    %c0_i32 = arith.constant 0 : i32
    %c0_i32_0 = arith.constant 0 : i32
    %c0_i32_1 = arith.constant 0 : i32
    return %c0_i32, %c0_i32_0 : i32, i32
  }
  func.func @transform_3(%arg0: i32) -> (i32, i32) {
    %c0_i32 = arith.constant 0 : i32
    %c0_i32_0 = arith.constant 0 : i32
    %c0_i32_1 = arith.constant 0 : i32
    return %c0_i32, %c0_i32_0 : i32, i32
  }
  func.func @transform_4(%arg0: i32) -> (i32, i32) {
    %c0_i32 = arith.constant 0 : i32
    %c0_i32_0 = arith.constant 0 : i32
    %c0_i32_1 = arith.constant 0 : i32
    return %c0_i32, %c0_i32_0 : i32, i32
  }
  func.func @transform_5(%arg0: i32) -> (i32, i32) {
    %c0_i32 = arith.constant 0 : i32
    %c0_i32_0 = arith.constant 0 : i32
    %c0_i32_1 = arith.constant 0 : i32
    return %c0_i32, %c0_i32_0 : i32, i32
  }
  func.func @transform_6(%arg0: i32) -> (i32, i32) {
    %c0_i32 = arith.constant 0 : i32
    %c0_i32_0 = arith.constant 0 : i32
    %c0_i32_1 = arith.constant 0 : i32
    return %c0_i32, %c0_i32_0 : i32, i32
  }
  func.func @transform_7(%arg0: i32) -> (i32, i32) {
    %c0_i32 = arith.constant 0 : i32
    %c0_i32_0 = arith.constant 0 : i32
    %c0_i32_1 = arith.constant 0 : i32
    return %c0_i32, %c0_i32_0 : i32, i32
  }
  func.func @transform_8(%arg0: i32) -> (i32, i32) {
    %c0_i32 = arith.constant 0 : i32
    %c0_i32_0 = arith.constant 0 : i32
    %c0_i32_1 = arith.constant 0 : i32
    return %c0_i32, %c0_i32_0 : i32, i32
  }
  func.func @transform_9(%arg0: i32) -> (i32, i32) {
    %c0_i32 = arith.constant 0 : i32
    %c0_i32_0 = arith.constant 0 : i32
    return %arg0, %c0_i32 : i32, i32
  }
}

</mosaic_0001>

<bundles_post_ra>
// kernel: neural_network_forward.1
= control target key start
LH: loop header
LB: loop body
LE: loop exit
PB: predicated region body
PF: predicated region fallthrough
CT: control target
= control target key end

     0   :  { %v552_v0 = vmov 0.0|0.0   ;;  %vm553_vm0 = vmmov 0   ;;  %v554_v3 = vmov 0.0   ;;  %vm42_vm1 = vcmask 130048   ;;  %s736_s1 = inlined_call_operand.vmem [shape: f32[16,32], index: 1, kind: input, shape index: {}]   ;;  %s737_s3 = inlined_call_operand.vmem [shape: f32[32,128], index: 3, kind: input, shape index: {}]   ;;  %s738_s0 = inlined_call_operand.vmem [shape: f32[8,16], index: 0, kind: input, shape index: {}]   ;;  %s739_s5 = inlined_call_operand.vmem [shape: f32[128,64], index: 5, kind: input, shape index: {}]   ;;  %s740_s2 = inlined_call_operand.vmem [shape: f32[1,32], index: 2, kind: input, shape index: {}]   ;;  %s741_s7 = inlined_call_operand.vmem [shape: f32[64,128], index: 7, kind: input, shape index: {}]   ;;  %s742_s4 = inlined_call_operand.vmem [shape: f32[1,128], index: 4, kind: input, shape index: {}]   ;;  %s743_s6 = inlined_call_operand.vmem [shape: f32[1,64], index: 6, kind: input, shape index: {}]   ;;  %s744_s8 = inlined_call_operand.vmem [shape: f32[1,128], index: 8, kind: input, shape index: {}]   ;;  %s745_s9 = inlined_call_operand.vmem [shape: f32[8,128], index: 9, kind: output, shape index: {}]  }
   0x1   :  { %504 = vmatprep.subr.bf16.mxu1 %v552_v0  ;;  %v33_v1 = vld [vmem:[%s736_s1] sm:$0xff]  ;;  %v34_v2 = vld [vmem:[%s736_s1 + $0x8] sm:$0xff]  ;;  %436 = vmatprep.mubr.msk.f32.mxu1 %vm553_vm0, %v554_v3  ;;  %v119_v9 = vld [vmem:[%s737_s3 + $0x10] sm:$0xff]  ;;  %vm128_vm2 = vcmask 261120   ;;  %vm312_vm3 = vcmask 523264  }
   0x2   :  { %v505_v4 = vpack.c.bf16 %v34_v2, %v33_v1  ;;  %v117_v5 = vld [vmem:[%s737_s3] sm:$0xff]  ;;  %v118_v6 = vld [vmem:[%s737_s3 + $0x8] sm:$0xff]  ;;  %513 = vmatprep.subr.bf16.mxu0 %v552_v0  ;;  %482 = vmatprep.mubr.msk.f32.mxu0 %vm553_vm0, %v554_v3  ;;  %v120_v10 = vld [vmem:[%s737_s3 + $0x18] sm:$0xff] }
   0x3   :  { %v32_v7 = vld [vmem:[%s738_s0] sm:$0xff]  ;;  %v508_v8 = vpack.c.bf16 %v118_v6, %v117_v5  ;;  %v511_v11 = vpack.c.bf16 %v120_v10, %v119_v9  ;;  %v204_v13 = vld [vmem:[%s739_s5 + $0x8] sm:$0xff]  ;;  %v205_v14 = vld [vmem:[%s739_s5 + $0x10] sm:$0xff] }
   0x4   :  { %506 = vmatpush3.bf16.msra.mxu1 %v505_v4  ;;  %v203_v12 = vld [vmem:[%s739_s5] sm:$0xff]  ;;  %v206_v16 = vld [vmem:[%s739_s5 + $0x18] sm:$0xff]  ;;  %v208_v19 = vld [vmem:[%s739_s5 + $0x28] sm:$0xff] }
   0x5   :  { %507 = vmatprep.subr.bf16.mxu1 %v552_v0  ;;  %v514_v15 = vpack.c.bf16 %v204_v13, %v203_v12  ;;  %v517_v17 = vpack.c.bf16 %v206_v16, %v205_v14  ;;  %v207_v18 = vld [vmem:[%s739_s5 + $0x20] sm:$0xff]  ;;  %v209_v21 = vld [vmem:[%s739_s5 + $0x30] sm:$0xff]  ;;  %v210_v22 = vld [vmem:[%s739_s5 + $0x38] sm:$0xff] }
   0x6   :  { %v520_v20 = vpack.c.bf16 %v208_v19, %v207_v18  ;;  %v523_v23 = vpack.c.bf16 %v210_v22, %v209_v21  ;;  %v211_v24 = vld [vmem:[%s739_s5 + $0x40] sm:$0xff]  ;;  %v212_v25 = vld [vmem:[%s739_s5 + $0x48] sm:$0xff]  ;;  %v213_v27 = vld [vmem:[%s739_s5 + $0x50] sm:$0xff] }
   0x7   :  { %437 = vmatmul.mubr.msk.f32.vlgmr.msra.gmra.mrb[0].mxu1 %vm42_vm1, %v32_v7  ;;  %515 = vmatpush3.bf16.msra.mxu0 %v514_v15  ;;  %v526_v26 = vpack.c.bf16 %v212_v25, %v211_v24  ;;  %v214_v28 = vld [vmem:[%s739_s5 + $0x58] sm:$0xff]  ;;  %v215_v30 = vld [vmem:[%s739_s5 + $0x60] sm:$0xff]  ;;  %v216_v31 = vld [vmem:[%s739_s5 + $0x68] sm:$0xff] }
   0x8   :  { %509 = vmatpush3.bf16.msra.mxu1 %v508_v8  ;;  %447 = vmatprep.mubr.msk.f32.mxu1 %vm553_vm0, %v554_v3  ;;  %v529_v29 = vpack.c.bf16 %v214_v28, %v213_v27  ;;  %v532_v32 = vpack.c.bf16 %v216_v31, %v215_v30  ;;  %v391_v33 = vld [vmem:[%s740_s2] ss:$0 sm:$0xff]  ;;  %v217_v38 = vld [vmem:[%s739_s5 + $0x70] sm:$0xff]  ;;  %v218_v39 = vld [vmem:[%s739_s5 + $0x78] sm:$0xff] }
   0x9   :  { %510 = vmatprep.subr.bf16.mxu1 %v552_v0  ;;  %516 = vmatprep.subr.bf16.mxu0 %v552_v0  ;;  %v535_v40 = vpack.c.bf16 %v218_v39, %v217_v38  ;;  %v297_v41 = vld [vmem:[%s741_s7] sm:$0xff]  ;;  %v298_v42 = vld [vmem:[%s741_s7 + $0x8] sm:$0xff]  ;;  %v299_v43 = vld [vmem:[%s741_s7 + $0x10] sm:$0xff] }
   0xa   :  { %v538_v44 = vpack.c.bf16 %v298_v42, %v297_v41  ;;  %v300_v45 = vld [vmem:[%s741_s7 + $0x18] sm:$0xff]  ;;  %v301_v47 = vld [vmem:[%s741_s7 + $0x20] sm:$0xff]  ;;  %v302_v48 = vld [vmem:[%s741_s7 + $0x28] sm:$0xff] }
   0xb   :  { %518 = vmatpush3.bf16.msra.mxu0 %v517_v17  ;;  %v541_v46 = vpack.c.bf16 %v300_v45, %v299_v43  ;;  %v544_v49 = vpack.c.bf16 %v302_v48, %v301_v47  ;;  %v393_v50 = vld [vmem:[%s742_s4] ss:$0 sm:$0xff]  ;;  %v303_v55 = vld [vmem:[%s741_s7 + $0x30] sm:$0xff]  ;;  %v304_v56 = vld [vmem:[%s741_s7 + $0x38] sm:$0xff] }
   0xc   :  { %512 = vmatpush3.bf16.msra.mxu1 %v511_v11  ;;  %519 = vmatprep.subr.bf16.mxu0 %v552_v0  ;;  %v547_v57 = vpack.c.bf16 %v304_v56, %v303_v55  ;;  %v395_v58 = vld [vmem:[%s743_s6] ss:$0 sm:$0xff] }
   0xd   :  { %537 = vmatprep.subr.bf16.mxu1 %v552_v0  ;;  %v396_v63 = vld [vmem:[%s744_s8] ss:$0 sm:$0xff] }
   0xf   :  { %521 = vmatpush3.bf16.msra.mxu0 %v520_v20 }
  0x10   :  { %522 = vmatprep.subr.bf16.mxu0 %v552_v0 }
  0x13   :  { %524 = vmatpush3.bf16.msra.mxu0 %v523_v23 }
  0x14   :  { %525 = vmatprep.subr.bf16.mxu0 %v552_v0 }
  0x17   :  { %527 = vmatpush3.bf16.msra.mxu0 %v526_v26 }
  0x18   :  { %528 = vmatprep.subr.bf16.mxu0 %v552_v0 }
  0x1b   :  { %530 = vmatpush3.bf16.msra.mxu0 %v529_v29 }
  0x1c   :  { %531 = vmatprep.subr.bf16.mxu0 %v552_v0 }
  0x1f   :  { %533 = vmatpush3.bf16.msra.mxu0 %v532_v32 }
  0x20   :  { %534 = vmatprep.subr.bf16.mxu0 %v552_v0 }
  0x23   :  { %536 = vmatpush3.bf16.msra.mxu0 %v535_v40 }
  0xda   :  { %v112_v34 = vpop.f32.mrb[0].mxu1 }
  0xdb   :  { %v113_v35 = vadd.f32 %v391_v33, %v112_v34  ;;  %v438_v36 = vpop.f32.mrb[1].mxu1 }
  0xdd   :  { %v116_v37 = vmax.f32 %v113_v35, 0.0 }
  0xdf   :  { %448 = vmatmul.mubr.msk.f32.vlgmr.msra.gmra.mrb[2].mxu1 %vm128_vm2, %v116_v37 }
  0xe0   :  { %501 = vmatprep.mubr.msk.f32.mxu1 %vm553_vm0, %v554_v3  ;;  %539 = vmatpush3.bf16.msra.mxu1 %v538_v44 }
  0xe1   :  { %540 = vmatprep.subr.bf16.mxu1 %v552_v0 }
  0xe4   :  { %542 = vmatpush3.bf16.msra.mxu1 %v541_v46 }
  0xe5   :  { %543 = vmatprep.subr.bf16.mxu1 %v552_v0 }
  0xe8   :  { %545 = vmatpush3.bf16.msra.mxu1 %v544_v49 }
  0xe9   :  { %546 = vmatprep.subr.bf16.mxu1 %v552_v0 }
  0xec   :  { %548 = vmatpush3.bf16.msra.mxu1 %v547_v57 }
 0x1b2   :  { %v198_v51 = vpop.f32.mrb[2].mxu1 }
 0x1b3   :  { %v199_v52 = vadd.f32 %v393_v50, %v198_v51  ;;  %v449_v53 = vpop.f32.mrb[3].mxu1 }
 0x1b5   :  { %v202_v54 = vmax.f32 %v199_v52, 0.0 }
 0x1b7   :  { %483 = vmatmul.mubr.f32.vlgmr.msra.gmra.mrb[0].mxu0 %v202_v54 }
 0x28a   :  { %v292_v59 = vpop.f32.mrb[0].mxu0 }
 0x28b   :  { %v293_v60 = vadd.f32 %v395_v58, %v292_v59  ;;  %v484_v61 = vpop.f32.mrb[1].mxu0 }
 0x28d   :  { %v296_v62 = vmax.f32 %v293_v60, 0.0 }
 0x28f   :  { %502 = vmatmul.mubr.msk.f32.vlgmr.msra.gmra.mrb[4].mxu1 %vm312_vm3, %v296_v62 }
 0x362   :  { %v382_v0 = vpop.f32.mrb[4].mxu1 }
 0x363   :  { %v383_v1 = vadd.f32 %v396_v63, %v382_v0  ;;  %v503_v2 = vpop.f32.mrb[5].mxu1 }
 0x365   :  { %386 = vst [vmem:[%s745_s9] sm:$0xff] %v383_v1 }

</bundles_post_ra>
